<compile_context>
chip_gen: v7x
topology: tpu7x:2x2x1
jax: 0.10.0
libtpu: 0.0.40
codegen_flags: <defaults>
</compile_context>

<pallas_src>
import functools

import jax
import jax.numpy as jnp
from jax.experimental import pallas as pl
from jax.experimental.pallas import tpu as pltpu


def _round_up(x: int, m: int) -> int:
    return (x + m - 1) // m * m


def _vmem_capacity_bytes() -> int:
    """Physical VMEM per TensorCore (fallback: 128 MiB, v5e/v6e)."""
    try:
        info = pltpu.get_tpu_info()
        cap = getattr(info, "vmem_capacity_bytes", None)
        if cap:
            return int(cap)
    except Exception:
        pass
    return 128 * 1024 * 1024


def _is_v7x() -> bool:
    try:
        return "v7" in jax.devices()[0].device_kind.lower()
    except Exception:
        return False


def _sublane_min(dtype) -> int:
    """Minimum second-minor (sublane) granularity for a dtype's packing."""
    isz = jnp.dtype(dtype).itemsize
    return max(8, 32 // max(isz, 1))      # f32 -> 8, bf16 -> 16, int8/fp8 -> 32


def _ffn_kernel(x_ref, w1_ref, b1_ref, w2_ref, b2_ref, o_ref, acc_ref):
    # x_ref:  (tm, Din)  [weight dtype]   w1_ref: (Din, tk)    b1_ref: (1, tk)   f32
    # w2_ref: (tk, Dout)                  b2_ref: (1, Dout)    f32
    # o_ref:  (tm, Dout)                  acc_ref: (tm, Dout)  f32 scratch
    k = pl.program_id(1)

    @pl.when(k == 0)
    def _init():
        acc_ref[...] = jnp.zeros_like(acc_ref)

    # x is already in the weight dtype (cast hoisted to the wrapper).
    # The first matmul contracts the (un-tiled) in_dim, so every k-tile of the
    # hidden layer is complete before the ReLU -> K-tiling the ffn dim is exact.
    h = jnp.dot(x_ref[...], w1_ref[...], preferred_element_type=jnp.float32)
    h = jnp.maximum(h + b1_ref[...], 0.0)                      # f32 bias + ReLU
    acc_ref[...] += jnp.dot(h.astype(w2_ref.dtype), w2_ref[...],
                            preferred_element_type=jnp.float32)

    @pl.when(k == pl.num_programs(1) - 1)
    def _finalize():
        o_ref[...] = (acc_ref[...] + b2_ref[...]).astype(o_ref.dtype)


def _pad2d(a, rows, cols):
    pr, pc = rows - a.shape[0], cols - a.shape[1]
    if pr or pc:
        a = jnp.pad(a, ((0, pr), (0, pc)))
    return a


@functools.partial(jax.jit, static_argnames=("tm", "tk"))
def ffn_pallas(x, w1, b1, w2, b2, *, tm=None, tk=None):
    """lin2(relu(lin1(x))) with weights stored as (in, out) (PyTorch transpose).

    x: (..., in_dim) -> (..., model_dim).  Pass bf16 x/weights for the fast
    MXU path; accumulation and bias/ReLU are always f32.  tm/tk default to
    generation-appropriate tiles (derived from VMEM capacity).
    """
    orig_shape = x.shape
    out_dtype = x.dtype
    in_dim = orig_shape[-1]
    ffn = w1.shape[1]
    model_dim = w2.shape[1]
    assert w1.shape[0] == in_dim and w2.shape[0] == ffn

    # Hoisted cast: x runs the MXU in the weight dtype.
    x2 = x.reshape(-1, in_dim).astype(w1.dtype)
    M = x2.shape[0]

    # ---- hardware-aware tile / VMEM selection -----------------------------
    vmem_cap = _vmem_capacity_bytes()
    big_vmem = vmem_cap > (96 << 20)                 # 128 MiB parts (v5e/v6e)
    vmem_limit = min(int(0.75 * vmem_cap), 112 << 20)
    tile_budget = int(0.85 * vmem_limit)             # headroom for compiler scratch

    w_isz = jnp.dtype(w1.dtype).itemsize
    out_isz = jnp.dtype(out_dtype).itemsize
    sublane = max(_sublane_min(w1.dtype), _sublane_min(out_dtype))

    # Lane dims: multiples of 128 for MXU / lane-dense output.
    din_p = _round_up(in_dim, 128)
    dout_p = _round_up(model_dim, 128)

    # Row tile: sublane-granular (NOT forced to 128) so small/decode M is cheap.
    tm_req = 1024 if big_vmem else 512
    if tm is not None:
        tm_req = max(int(tm), sublane)
    tm_req = _round_up(tm_req, sublane)
    tm = min(tm_req, _round_up(M, sublane))

    # ffn (reduction) tile: multiple of 128; fatter on 128 MiB parts (fewer
    # k steps -> less f32 accumulator RMW traffic, matters most on v5e).
    tk_req = 1024 if big_vmem else 512
    if tk is not None:
        tk_req = max(int(tk), 128)
    tk_req = _round_up(tk_req, 128)
    tk = min(tk_req, _round_up(ffn, 128))

    # v7x megacore: the "parallel" rows axis shards across 2 TensorCores, so
    # make sure there are at least 2 row tiles when M allows it.
    if _is_v7x() and M > sublane and (_round_up(M, tm) // tm) < 2:
        tm = _round_up(-(-M // 2), sublane)

    # VMEM budget: double-buffered input/output tiles + f32 accumulator.
    def _vmem_bytes(tm_, tk_):
        dbuf_in = 2 * (tm_ * din_p * w_isz            # x tile
                       + din_p * tk_ * w_isz          # W1 tile
                       + tk_ * dout_p * w_isz         # W2 tile
                       + tk_ * 4 + dout_p * 4)        # biases (f32)
        dbuf_out = 2 * tm_ * dout_p * out_isz
        acc = tm_ * dout_p * 4
        return dbuf_in + dbuf_out + acc

    while _vmem_bytes(tm, tk) > tile_budget:
        new_tm = max(sublane, ((tm // 2) // sublane) * sublane)
        new_tk = max(128, ((tk // 2) // 128) * 128)
        if new_tm < tm:
            tm = new_tm
        elif new_tk < tk:
            tk = new_tk
        else:
            break

    m_p = _round_up(M, tm)                            # ragged rows -> zero-pad
    ffn_p = _round_up(ffn, tk)

    # ---- zero padding keeps semantics exact --------------------------------
    #   extra in_dim cols of x meet zero rows of W1; extra hidden units have
    #   zero weights AND zero bias (relu(0)=0); extra model cols are sliced off.
    x2p = _pad2d(x2, m_p, din_p)
    w1p = _pad2d(w1, din_p, ffn_p)
    w2p = _pad2d(w2, ffn_p, dout_p)
    b1p = jnp.pad(b1.astype(jnp.float32), (0, ffn_p - ffn)).reshape(1, ffn_p)
    b2p = jnp.pad(b2.astype(jnp.float32), (0, dout_p - model_dim)).reshape(1, dout_p)

    grid = (m_p // tm, ffn_p // tk)                   # rows parallel, ffn reduction last
    n_row_tiles = grid[0]

    # Weights (and biases) are re-streamed from HBM once per row tile.
    cost = pl.CostEstimate(
        flops=2 * m_p * (din_p * ffn_p + ffn_p * dout_p),
        transcendentals=0,
        bytes_accessed=int(
            m_p * din_p * w_isz
            + n_row_tiles * din_p * ffn_p * w_isz
            + n_row_tiles * ffn_p * dout_p * w_isz
            + n_row_tiles * (ffn_p + dout_p) * 4
            + m_p * dout_p * out_isz),
    )

    out = pl.pallas_call(
        _ffn_kernel,
        out_shape=jax.ShapeDtypeStruct((m_p, dout_p), out_dtype),
        grid_spec=pltpu.PrefetchScalarGridSpec(
            num_scalar_prefetch=0,
            grid=grid,
            in_specs=[
                pl.BlockSpec((tm, din_p), lambda i, k: (i, 0)),   # x rows (resident over k)
                pl.BlockSpec((din_p, tk), lambda i, k: (0, k)),   # W1 k-tile
                pl.BlockSpec((1, tk), lambda i, k: (0, k)),       # b1 k-tile (f32)
                pl.BlockSpec((tk, dout_p), lambda i, k: (k, 0)),  # W2 k-tile
                pl.BlockSpec((1, dout_p), lambda i, k: (0, 0)),   # b2 (f32)
            ],
            out_specs=pl.BlockSpec((tm, dout_p), lambda i, k: (i, 0)),
            scratch_shapes=[pltpu.VMEM((tm, dout_p), jnp.float32)],
        ),
        compiler_params=pltpu.CompilerParams(
            dimension_semantics=("parallel", "arbitrary"),
            vmem_limit_bytes=vmem_limit,
        ),
        cost_estimate=cost,
    )(x2p, w1p, b1p, w2p, b2p)

    out = out[:M, :model_dim]
    return out.reshape(*orig_shape[:-1], model_dim)


def init_ffn_params(key, in_dim, model_dim, ffn_size, dtype=jnp.float32):
    """nn.Linear-style U(-1/sqrt(fan_in), 1/sqrt(fan_in)); weights stored (in, out)."""
    k1, k2, k3, k4 = jax.random.split(key, 4)
    bound1 = 1.0 / jnp.sqrt(in_dim)
    bound2 = 1.0 / jnp.sqrt(ffn_size)
    w1 = jax.random.uniform(k1, (in_dim, ffn_size), dtype, -bound1, bound1)
    b1 = jax.random.uniform(k2, (ffn_size,), dtype, -bound1, bound1)
    w2 = jax.random.uniform(k3, (ffn_size, model_dim), dtype, -bound2, bound2)
    b2 = jax.random.uniform(k4, (model_dim,), dtype, -bound2, bound2)
    return w1, b1, w2, b2


def ffn_reference(x, w1, b1, w2, b2):
    h = jnp.maximum(x @ w1 + b1, 0.0)
    return h @ w2 + b2


if __name__ == "__main__":
    key = jax.random.PRNGKey(0)
    kx, kp = jax.random.split(key)

    # Small but lane-dense shapes (multiples of 128 on the feature dims).
    batch, seq, in_dim, model_dim, ffn_size = 2, 64, 128, 128, 256

    x = jax.random.normal(kx, (batch, seq, in_dim), dtype=jnp.float32)
    w1, b1, w2, b2 = init_ffn_params(kp, in_dim, model_dim, ffn_size)

    # f32 path
    y = jax.block_until_ready(ffn_pallas(x, w1, b1, w2, b2))
    y_ref = ffn_reference(x, w1, b1, w2, b2)
    assert y.shape == (batch, seq, model_dim)
    assert jnp.allclose(y, y_ref, atol=1e-4, rtol=1e-4), "f32 mismatch vs reference"

    # ragged rows: batch*seq not a multiple of the row tile (exercises padding)
    x_r = jax.random.normal(kx, (3, 50, in_dim), dtype=jnp.float32)
    y_r = jax.block_until_ready(ffn_pallas(x_r, w1, b1, w2, b2))
    assert jnp.allclose(y_r, ffn_reference(x_r, w1, b1, w2, b2),
                        atol=1e-4, rtol=1e-4), "ragged-row mismatch vs reference"

    # decode-sized M (sublane-granular row tile, no 128-row padding)
    x_d = jax.random.normal(kx, (1, 9, in_dim), dtype=jnp.float32)
    y_d = jax.block_until_ready(ffn_pallas(x_d, w1, b1, w2, b2))
    assert jnp.allclose(y_d, ffn_reference(x_d, w1, b1, w2, b2),
                        atol=1e-4, rtol=1e-4), "decode-shape mismatch vs reference"

    # bf16 fast path: bf16 MXU inputs, f32 accumulation, bf16 output
    xb = x.astype(jnp.bfloat16)
    w1b, w2b = w1.astype(jnp.bfloat16), w2.astype(jnp.bfloat16)
    yb = jax.block_until_ready(ffn_pallas(xb, w1b, b1, w2b, b2))
    yb_ref = ffn_reference(xb.astype(jnp.float32), w1b.astype(jnp.float32), b1,
                           w2b.astype(jnp.float32), b2)
    assert yb.dtype == jnp.bfloat16
    assert jnp.allclose(yb.astype(jnp.float32), yb_ref,
                        atol=5e-2, rtol=5e-2), "bf16 mismatch vs reference"

    print("KERNEL_OK")
</pallas_src>

<mosaic_0001>
module attributes {stable_mosaic.version = 11 : i64} {
  func.func @_ffn_kernel(%arg0: i32, %arg1: i32, %arg2: memref<128x128xf32, #tpu.memory_space<vmem>>, %arg3: memref<128x256xf32, #tpu.memory_space<vmem>>, %arg4: memref<1x256xf32, #tpu.memory_space<vmem>>, %arg5: memref<256x128xf32, #tpu.memory_space<vmem>>, %arg6: memref<1x128xf32, #tpu.memory_space<vmem>>, %arg7: memref<128x128xf32, #tpu.memory_space<vmem>>, %arg8: memref<128x128xf32, #tpu.memory_space<vmem>>) attributes {dimension_semantics = [#tpu.dimension_semantics<parallel>, #tpu.dimension_semantics<arbitrary>], iteration_bounds = array<i64: 1, 1>, scalar_prefetch = 0 : i64, scratch_operands = 1 : i64, tpu.core_type = #tpu.core_type<tc>, window_params = [{transform_indices = @transform_0, window_bounds = array<i64: 128, 128>}, {transform_indices = @transform_1, window_bounds = array<i64: 128, 256>}, {transform_indices = @transform_2, window_bounds = array<i64: 1, 256>}, {transform_indices = @transform_3, window_bounds = array<i64: 256, 128>}, {pipeline_mode = #tpu.pipeline_mode<synchronous>, transform_indices = @transform_4, window_bounds = array<i64: 1, 128>}, {transform_indices = @transform_5, window_bounds = array<i64: 128, 128>}]} {
    %c0_i32 = arith.constant 0 : i32
    %0 = arith.cmpi eq, %arg1, %c0_i32 : i32
    %1 = arith.extui %0 : i1 to i32
    %c0_i32_0 = arith.constant 0 : i32
    %2 = arith.cmpi ne, %1, %c0_i32_0 : i32
    scf.if %2 {
      %cst_16 = arith.constant 0.000000e+00 : f32
      %19 = vector.broadcast %cst_16 : f32 to vector<128x128xf32>
      %c0_17 = arith.constant 0 : index
      %c0_18 = arith.constant 0 : index
      %20 = vector.load %arg8[%c0_17, %c0_18] : memref<128x128xf32, #tpu.memory_space<vmem>>, vector<128x128xf32>
      tpu.vector_store %arg8[%c0_17, %c0_18], %19 {strides = array<i32>} : memref<128x128xf32, #tpu.memory_space<vmem>>, vector<128x128xf32>,
    } else {
    }
    %c0 = arith.constant 0 : index
    %c0_1 = arith.constant 0 : index
    %3 = vector.load %arg2[%c0, %c0_1] : memref<128x128xf32, #tpu.memory_space<vmem>>, vector<128x128xf32>
    %c0_2 = arith.constant 0 : index
    %c0_3 = arith.constant 0 : index
    %4 = vector.load %arg3[%c0_2, %c0_3] : memref<128x256xf32, #tpu.memory_space<vmem>>, vector<128x256xf32>
    %cst = arith.constant dense<0.000000e+00> : vector<128x256xf32>
    %5 = tpu.matmul %3, %4, %cst {dimension_numbers = #tpu.dot_dimension_numbers<[1], [0], [0], [1], [0, 0, 1, 1], [], []>} : vector<128x128xf32>, vector<128x256xf32>, vector<128x256xf32> -> vector<128x256xf32>
    %c0_4 = arith.constant 0 : index
    %c0_5 = arith.constant 0 : index
    %6 = vector.load %arg4[%c0_4, %c0_5] : memref<1x256xf32, #tpu.memory_space<vmem>>, vector<1x256xf32>
    %7 = vector.broadcast %6 : vector<1x256xf32> to vector<128x256xf32>
    %8 = arith.addf %5, %7 : vector<128x256xf32>
    %cst_6 = arith.constant 0.000000e+00 : f32
    %9 = vector.broadcast %cst_6 : f32 to vector<128x256xf32>
    %10 = arith.maximumf %8, %9 : vector<128x256xf32>
    %c0_7 = arith.constant 0 : index
    %c0_8 = arith.constant 0 : index
    %11 = vector.load %arg8[%c0_7, %c0_8] : memref<128x128xf32, #tpu.memory_space<vmem>>, vector<128x128xf32>
    %c0_9 = arith.constant 0 : index
    %c0_10 = arith.constant 0 : index
    %12 = vector.load %arg5[%c0_9, %c0_10] : memref<256x128xf32, #tpu.memory_space<vmem>>, vector<256x128xf32>
    %cst_11 = arith.constant dense<0.000000e+00> : vector<128x128xf32>
    %13 = tpu.matmul %10, %12, %cst_11 {dimension_numbers = #tpu.dot_dimension_numbers<[1], [0], [0], [1], [0, 0, 1, 1], [], []>} : vector<128x256xf32>, vector<256x128xf32>, vector<128x128xf32> -> vector<128x128xf32>
    %14 = arith.addf %11, %13 : vector<128x128xf32>
    %c0_12 = arith.constant 0 : index
    %c0_13 = arith.constant 0 : index
    %15 = vector.load %arg8[%c0_12, %c0_13] : memref<128x128xf32, #tpu.memory_space<vmem>>, vector<128x128xf32>
    tpu.vector_store %arg8[%c0_12, %c0_13], %14 {strides = array<i32>} : memref<128x128xf32, #tpu.memory_space<vmem>>, vector<128x128xf32>,
    %c0_i32_14 = arith.constant 0 : i32
    %16 = arith.cmpi eq, %arg1, %c0_i32_14 : i32
    %17 = arith.extui %16 : i1 to i32
    %c0_i32_15 = arith.constant 0 : i32
    %18 = arith.cmpi ne, %17, %c0_i32_15 : i32
    scf.if %18 {
      %c0_16 = arith.constant 0 : index
      %c0_17 = arith.constant 0 : index
      %19 = vector.load %arg8[%c0_16, %c0_17] : memref<128x128xf32, #tpu.memory_space<vmem>>, vector<128x128xf32>
      %c0_18 = arith.constant 0 : index
      %c0_19 = arith.constant 0 : index
      %20 = vector.load %arg6[%c0_18, %c0_19] : memref<1x128xf32, #tpu.memory_space<vmem>>, vector<1x128xf32>
      %21 = vector.broadcast %20 : vector<1x128xf32> to vector<128x128xf32>
      %22 = arith.addf %19, %21 : vector<128x128xf32>
      %c0_20 = arith.constant 0 : index
      %c0_21 = arith.constant 0 : index
      %23 = vector.load %arg7[%c0_20, %c0_21] : memref<128x128xf32, #tpu.memory_space<vmem>>, vector<128x128xf32>
      tpu.vector_store %arg7[%c0_20, %c0_21], %22 {strides = array<i32>} : memref<128x128xf32, #tpu.memory_space<vmem>>, vector<128x128xf32>,
    } else {
    }
    return
  }
  func.func @transform_0(%arg0: i32, %arg1: i32) -> (i32, i32) {
    %c0_i32 = arith.constant 0 : i32
    %c0_i32_0 = arith.constant 0 : i32
    return %arg0, %c0_i32 : i32, i32
  }
  func.func @transform_1(%arg0: i32, %arg1: i32) -> (i32, i32) {
    %c0_i32 = arith.constant 0 : i32
    %c0_i32_0 = arith.constant 0 : i32
    return %c0_i32, %arg1 : i32, i32
  }
  func.func @transform_2(%arg0: i32, %arg1: i32) -> (i32, i32) {
    %c0_i32 = arith.constant 0 : i32
    %c0_i32_0 = arith.constant 0 : i32
    return %c0_i32, %arg1 : i32, i32
  }
  func.func @transform_3(%arg0: i32, %arg1: i32) -> (i32, i32) {
    %c0_i32 = arith.constant 0 : i32
    %c0_i32_0 = arith.constant 0 : i32
    return %arg1, %c0_i32 : i32, i32
  }
  func.func @transform_4(%arg0: i32, %arg1: i32) -> (i32, i32) {
    %c0_i32 = arith.constant 0 : i32
    %c0_i32_0 = arith.constant 0 : i32
    %c0_i32_1 = arith.constant 0 : i32
    return %c0_i32, %c0_i32_0 : i32, i32
  }
  func.func @transform_5(%arg0: i32, %arg1: i32) -> (i32, i32) {
    %c0_i32 = arith.constant 0 : i32
    %c0_i32_0 = arith.constant 0 : i32
    return %arg0, %c0_i32 : i32, i32
  }
}

</mosaic_0001>

<bundles_post_ra>
// kernel: ffn_pallas.1
= control target key start
LH: loop header
LB: loop body
LE: loop exit
PB: predicated region body
PF: predicated region fallthrough
CT: control target
= control target key end

     0   :  { %10 = vsyncpa [#allocation4], 0  ;;  %s1148_s0 = inlined_call_operand.hbm [shape: f32[128,128], index: 0, kind: input, shape index: {}]   ;;  %s1149_s1 = inlined_call_operand.hbm [shape: f32[128,256], index: 1, kind: input, shape index: {}]   ;;  %s1150_s2 = inlined_call_operand.hbm [shape: f32[1,256], index: 2, kind: input, shape index: {}]   ;;  %s1151_s3 = inlined_call_operand.hbm [shape: f32[256,128], index: 3, kind: input, shape index: {}]   ;;  %s1152_s4 = inlined_call_operand.hbm [shape: f32[1,128], index: 4, kind: input, shape index: {}]   ;;  %s1153_s5 = inlined_call_operand.hbm [shape: f32[128,128], index: 5, kind: output, shape index: {}]  }
   0x1   :  { %11 = vsyncpa [#allocation7], 0 }
   0x2   :  { %12 = vsyncpa [#allocation10], 0 }
   0x3   :  { %13 = vsyncpa [#allocation5], 0  ;;  %s956_s18 = smov [#allocation6]   ;;  %s816_s22 = scalar_lea.hbm %s1149_s1, 4096 }
   0x4   :  { %s31_s19 = sshll.u32 %s956_s18, 4  ;;  %p817_p0 = scmp.ne.s32.totalorder %s1149_s1, %s816_s22  ;;  %s32_s19 = int_to_ptr.vmem [resolvable:$true] %s31_s19 }
   0x5   :  { %p820_p1 = scmp.lt.u32.totalorder %s816_s22, %s1149_s1 }
   0x7   :  { %p822_p2 = pnand %p820_p1, %p817_p0 }
   0x9   :  { %825 = shalt.err (!%p822_p2)
}
   0xa   :  { %s826_s27 = scalar_lea.vmem %s32_s19, 4096  ;;  %p831_p4 = scmp.lt.s32.totalorder %s32_s19, %s32_s19 }
   0xb   :  { %p827_p3 = scmp.ne.s32.totalorder %s32_s19, %s826_s27  ;;  %p832_p5 = scmp.lt.s32.totalorder %s826_s27, %s826_s27 }
   0xd   :  { %p833_p6 = por %p832_p5, %p831_p4 }
   0xf   :  { %p834_p7 = pnand %p833_p6, %p827_p3 }
  0x11   :  { %837 = shalt.err (!%p834_p7)
}
  0x12   :  { %s957_s28 = smov 256   ;;  %s958_s29 = smov 16  }
  0x13   :  { %37 = dma.hbm_to_vmem [thread:$0]  %s1149_s1, 4096, %s32_s19, [#allocation7], %s957_s28, %s957_s28, %s958_s29  }
  0x14   :  { %s959_s7 = smov [#allocation9]   ;;  %s960_s9 = smov [#allocation3]  }
  0x15   :  { %s53_s8 = sshll.u32 %s959_s7, 4  ;;  %s19_s10 = sshll.u32 %s960_s9, 4  ;;  %s54_s8 = int_to_ptr.vmem [resolvable:$true] %s53_s8  ;;  %s20_s10 = int_to_ptr.vmem [resolvable:$true] %s19_s10 }
  0x16   :  { %s838_s13 = scalar_lea.hbm %s1151_s3, 4096 }
  0x17   :  { %p839_p8 = scmp.ne.s32.totalorder %s1151_s3, %s838_s13  ;;  %p842_p9 = scmp.lt.u32.totalorder %s838_s13, %s1151_s3 }
  0x19   :  { %p844_p10 = pnand %p842_p9, %p839_p8 }
  0x1b   :  { %847 = shalt.err (!%p844_p10)
}
  0x1c   :  { %s848_s1 = scalar_lea.vmem %s54_s8, 4096  ;;  %p853_p12 = scmp.lt.s32.totalorder %s54_s8, %s54_s8 }
  0x1d   :  { %p849_p11 = scmp.ne.s32.totalorder %s54_s8, %s848_s1  ;;  %p854_p13 = scmp.lt.s32.totalorder %s848_s1, %s848_s1 }
  0x1f   :  { %p855_p0 = por %p854_p13, %p853_p12 }
  0x21   :  { %p856_p1 = pnand %p855_p0, %p849_p11 }
  0x23   :  { %859 = shalt.err (!%p856_p1)
}
  0x24   :  { %s961_s18 = smov 128   ;;  %s962_s19 = smov 8  }
  0x25   :  { %59 = dma.hbm_to_vmem [thread:$0]  %s1151_s3, 4096, %s54_s8, [#allocation10], %s961_s18, %s961_s18, %s962_s19  }
  0x26   :  { %s860_s24 = scalar_lea.hbm %s1148_s0, 2048 }
  0x27   :  { %p861_p2 = scmp.ne.s32.totalorder %s1148_s0, %s860_s24  ;;  %p864_p3 = scmp.lt.u32.totalorder %s860_s24, %s1148_s0 }
  0x29   :  { %p866_p4 = pnand %p864_p3, %p861_p2 }
  0x2b   :  { %869 = shalt.err (!%p866_p4)
}
  0x2c   :  { %s870_s29 = scalar_lea.vmem %s20_s10, 2048  ;;  %p875_p6 = scmp.lt.s32.totalorder %s20_s10, %s20_s10 }
  0x2d   :  { %p871_p5 = scmp.ne.s32.totalorder %s20_s10, %s870_s29  ;;  %p876_p7 = scmp.lt.s32.totalorder %s870_s29, %s870_s29 }
  0x2f   :  { %p877_p8 = por %p876_p7, %p875_p6 }
  0x31   :  { %p878_p9 = pnand %p877_p8, %p871_p5 }
  0x33   :  { %881 = shalt.err (!%p878_p9)
}
  0x34   :  { %25 = dma.hbm_to_vmem [thread:$0]  %s1148_s0, 2048, %s20_s10, [#allocation4], %s961_s18, %s961_s18, %s962_s19  }
  0x35   :  { %s963_s6 = smov [#allocation8]   ;;  %s964_s8 = smov [#allocation11]  }
  0x36   :  { %s44_s7 = sshll.u32 %s963_s6, 4  ;;  %s66_s9 = sshll.u32 %s964_s8, 4  ;;  %s45_s7 = int_to_ptr.vmem [resolvable:$true] %s44_s7  ;;  %s67_s9 = int_to_ptr.vmem [resolvable:$true] %s66_s9 }
  0x37   :  { %s882_s13 = scalar_lea.hbm %s1150_s2, 32 }
  0x38   :  { %p883_p10 = scmp.ne.s32.totalorder %s1150_s2, %s882_s13  ;;  %p886_p11 = scmp.lt.u32.totalorder %s882_s13, %s1150_s2 }
  0x3a   :  { %p888_p12 = pnand %p886_p11, %p883_p10 }
  0x3c   :  { %891 = shalt.err (!%p888_p12)
}
  0x3d   :  { %s892_s0 = scalar_lea.vmem %s45_s7, 32  ;;  %p897_p0 = scmp.lt.s32.totalorder %s45_s7, %s45_s7 }
  0x3e   :  { %p893_p13 = scmp.ne.s32.totalorder %s45_s7, %s892_s0  ;;  %p898_p1 = scmp.lt.s32.totalorder %s892_s0, %s892_s0 }
  0x40   :  { %p899_p2 = por %p898_p1, %p897_p0 }
  0x42   :  { %p900_p3 = pnand %p899_p2, %p893_p13 }
  0x44   :  { %903 = shalt.err (!%p900_p3)
}
  0x45   :  { %47 = dma.hbm_to_vmem [thread:$0]  %s1150_s2, 32, %s45_s7, [#allocation7]  }
  0x46   :  { %s904_s22 = scalar_lea.hbm %s1152_s4, 16 }
  0x47   :  { %p905_p4 = scmp.ne.s32.totalorder %s1152_s4, %s904_s22  ;;  %p908_p5 = scmp.lt.u32.totalorder %s904_s22, %s1152_s4 }
  0x49   :  { %p910_p6 = pnand %p908_p5, %p905_p4 }
  0x4b   :  { %913 = shalt.err (!%p910_p6)
}
  0x4c   :  { %s914_s27 = scalar_lea.vmem %s67_s9, 16  ;;  %s918_s28 = scalar_lea.vmem %s67_s9, 32 }
  0x4d   :  { %p915_p7 = scmp.ne.s32.totalorder %s67_s9, %s914_s27  ;;  %p919_p8 = scmp.lt.s32.totalorder %s67_s9, %s67_s9 }
  0x4e   :  { %p920_p9 = scmp.lt.s32.totalorder %s918_s28, %s914_s27 }
  0x50   :  { %p921_p10 = por %p920_p9, %p919_p8 }
  0x52   :  { %p922_p11 = pnand %p921_p10, %p915_p7 }
  0x54   :  { %925 = shalt.err (!%p922_p11)
}
  0x55   :  { %69 = dma.hbm_to_vmem [thread:$0]  %s1152_s4, 16, %s67_s9, [#allocation10]  }
  0x56   :  { %948 = dma.done.wait [#allocation4], 2048  }
  0x57   :  { %949 = vsyncadd [#allocation4], 4294965248 }
  0x58   :  { %950 = dma.done.wait [#allocation7], 4128  }
  0x59   :  { %951 = vsyncadd [#allocation7], 4294963168 }
  0x5a   :  { %952 = dma.done.wait [#allocation10], 4112  }
  0x5b   :  { %953 = vsyncadd [#allocation10], 4294963184  ;;  %v965_v0 = vmov 0.0   ;;  %v122_v1 = vld [vmem:[#allocation6 + $0x8] sm:$0xff]  ;;  %v124_v2 = vld [vmem:[#allocation6 + $0x18] sm:$0xff]  ;;  %s966_s4 = smov [#allocation12]  }
  0x5c   :  { %229 = vmatprep.mubr.f32.mxu0 %v965_v0  ;;  %v121_v3 = vld [vmem:[#allocation6] sm:$0xff]  ;;  %v741_v4 = vpack.c.bf16 %v124_v2, %v122_v1  ;;  %v123_v5 = vld [vmem:[#allocation6 + $0x10] sm:$0xff]  ;;  %v126_v6 = vld [vmem:[#allocation6 + $0x28] sm:$0xff]  ;;  %s646_s3 = sshll.u32 %s966_s4, 4  ;;  %s647_s3 = int_to_ptr.vmem [resolvable:$true] %s646_s3 }
  0x5d   :  { %v128_v7 = vld [vmem:[#allocation6 + $0x38] sm:$0xff]  ;;  %v743_v8 = vpack.c.bf16 %v123_v5, %v121_v3  ;;  %v125_v10 = vld [vmem:[#allocation6 + $0x20] sm:$0xff]  ;;  %v127_v11 = vld [vmem:[#allocation6 + $0x30] sm:$0xff]  ;;  %s926_s30 = scalar_lea.vmem %s647_s3, 2048  ;;  %p931_p13 = scmp.lt.s32.totalorder %s647_s3, %s647_s3 }
  0x5e   :  { %v745_v9 = vpack.c.bf16 %v128_v7, %v126_v6  ;;  %v130_v12 = vld [vmem:[#allocation6 + $0x48] sm:$0xff]  ;;  %742 = vmatprep.subr.bf16.mxu0 %v741_v4  ;;  %v132_v13 = vld [vmem:[#allocation6 + $0x58] sm:$0xff]  ;;  %v747_v14 = vpack.c.bf16 %v127_v11, %v125_v10  ;;  %v129_v16 = vld [vmem:[#allocation6 + $0x40] sm:$0xff]  ;;  %p927_p12 = scmp.ne.s32.totalorder %s647_s3, %s926_s30  ;;  %p932_p0 = scmp.lt.s32.totalorder %s926_s30, %s926_s30 }
  0x5f   :  { %744 = vmatpush1.bf16.msra.mxu0 %v743_v8  ;;  %v749_v15 = vpack.c.bf16 %v132_v13, %v130_v12  ;;  %v131_v17 = vld [vmem:[#allocation6 + $0x50] sm:$0xff]  ;;  %v134_v18 = vld [vmem:[#allocation6 + $0x68] sm:$0xff]  ;;  %v136_v19 = vld [vmem:[#allocation6 + $0x78] sm:$0xff] }
  0x60   :  { %746 = vmatprep.subr.bf16.mxu0 %v745_v9  ;;  %v751_v20 = vpack.c.bf16 %v131_v17, %v129_v16  ;;  %v753_v21 = vpack.c.bf16 %v136_v19, %v134_v18  ;;  %v133_v22 = vld [vmem:[#allocation6 + $0x60] sm:$0xff]  ;;  %v135_v23 = vld [vmem:[#allocation6 + $0x70] sm:$0xff]  ;;  %v138_v24 = vld [vmem:[#allocation6 + $0x88] sm:$0xff]  ;;  %p933_p1 = por %p932_p0, %p931_p13 }
  0x61   :  { %v140_v25 = vld [vmem:[#allocation6 + $0x98] sm:$0xff]  ;;  %v755_v26 = vpack.c.bf16 %v135_v23, %v133_v22  ;;  %v137_v28 = vld [vmem:[#allocation6 + $0x80] sm:$0xff]  ;;  %v139_v29 = vld [vmem:[#allocation6 + $0x90] sm:$0xff] }
  0x62   :  { %v757_v27 = vpack.c.bf16 %v140_v25, %v138_v24  ;;  %v142_v30 = vld [vmem:[#allocation6 + $0xa8] sm:$0xff]  ;;  %v144_v31 = vld [vmem:[#allocation6 + $0xb8] sm:$0xff]  ;;  %v141_v32 = vld [vmem:[#allocation6 + $0xa0] sm:$0xff]  ;;  %v759_v34 = vpack.c.bf16 %v139_v29, %v137_v28  ;;  %p934_p2 = pnand %p933_p1, %p927_p12 }
  0x63   :  { %748 = vmatpush1.bf16.msra.mxu0 %v747_v14  ;;  %v143_v33 = vld [vmem:[#allocation6 + $0xb0] sm:$0xff]  ;;  %v146_v35 = vld [vmem:[#allocation6 + $0xc8] sm:$0xff]  ;;  %v148_v36 = vld [vmem:[#allocation6 + $0xd8] sm:$0xff]  ;;  %v761_v40 = vpack.c.bf16 %v144_v31, %v142_v30 }
  0x64   :  { %750 = vmatprep.subr.bf16.mxu0 %v749_v15  ;;  %v390_v37 = vld [vmem:[#allocation9 + $0x80] sm:$0xff]  ;;  %v391_v38 = vld [vmem:[#allocation9 + $0x88] sm:$0xff]  ;;  %v392_v43 = vld [vmem:[#allocation9 + $0x90] sm:$0xff]  ;;  %v763_v51 = vpack.c.bf16 %v143_v33, %v141_v32  ;;  %v765_v55 = vpack.c.bf16 %v148_v36, %v146_v35 }
  0x65   :  { %v374_v39 = vld [vmem:[#allocation9] sm:$0xff]  ;;  %v773_v41 = vpack.c.bf16 %v391_v38, %v390_v37  ;;  %v375_v42 = vld [vmem:[#allocation9 + $0x8] sm:$0xff]  ;;  %v393_v44 = vld [vmem:[#allocation9 + $0x98] sm:$0xff] }
  0x66   :  { %v775_v45 = vpack.c.bf16 %v375_v42, %v374_v39  ;;  %v777_v46 = vpack.c.bf16 %v393_v44, %v392_v43  ;;  %v376_v47 = vld [vmem:[#allocation9 + $0x10] sm:$0xff]  ;;  %v377_v48 = vld [vmem:[#allocation9 + $0x18] sm:$0xff]  ;;  %v394_v49 = vld [vmem:[#allocation9 + $0xa0] sm:$0xff] }
  0x67   :  { %752 = vmatpush1.bf16.msra.mxu0 %v751_v20  ;;  %774 = vmatprep.subr.bf16.mxu1 %v773_v41  ;;  %v395_v50 = vld [vmem:[#allocation9 + $0xa8] sm:$0xff]  ;;  %v145_v52 = vld [vmem:[#allocation6 + $0xc0] sm:$0xff]  ;;  %v779_v54 = vpack.c.bf16 %v377_v48, %v376_v47  ;;  %v152_v60 = vld [vmem:[#allocation6 + $0xf8] sm:$0xff] }
  0x68   :  { %754 = vmatprep.subr.bf16.mxu0 %v753_v21  ;;  %v147_v53 = vld [vmem:[#allocation6 + $0xd0] sm:$0xff]  ;;  %776 = vmatpush3.bf16.msra.mxu1 %v775_v45  ;;  %v150_v56 = vld [vmem:[#allocation6 + $0xe8] sm:$0xff]  ;;  %v781_v57 = vpack.c.bf16 %v395_v50, %v394_v49  ;;  %v397_v62 = vld [vmem:[#allocation9 + $0xb8] sm:$0xff]  ;;  %v155_v50 = vlaneseq }
  0x69   :  { %778 = vmatprep.subr.bf16.mxu1 %v777_v46  ;;  %v378_v58 = vld [vmem:[#allocation9 + $0x20] sm:$0xff]  ;;  %v379_v59 = vld [vmem:[#allocation9 + $0x28] sm:$0xff]  ;;  %v396_v61 = vld [vmem:[#allocation9 + $0xb0] sm:$0xff]  ;;  %v767_v63 = vpack.c.bf16 %v147_v53, %v145_v52  ;;  %v769_v3 = vpack.c.bf16 %v152_v60, %v150_v56 }
  0x6a   :  { %v149_v1 = vld [vmem:[#allocation6 + $0xe0] sm:$0xff]  ;;  %v783_v2 = vpack.c.bf16 %v379_v59, %v378_v58  ;;  %v151_v4 = vld [vmem:[#allocation6 + $0xf0] sm:$0xff]  ;;  %v785_v5 = vpack.c.bf16 %v397_v62, %v396_v61  ;;  %v106_v24 = vld [vmem:[#allocation3 + $0x8] sm:$0xff] }
  0x6b   :  { %756 = vmatpush1.bf16.msra.mxu0 %v755_v26  ;;  %v380_v6 = vld [vmem:[#allocation9 + $0x30] sm:$0xff]  ;;  %v381_v7 = vld [vmem:[#allocation9 + $0x38] sm:$0xff]  ;;  %v398_v8 = vld [vmem:[#allocation9 + $0xc0] sm:$0xff]  ;;  %v771_v10 = vpack.c.bf16 %v151_v4, %v149_v1 }
  0x6c   :  { %758 = vmatprep.subr.bf16.mxu0 %v757_v27  ;;  %780 = vmatpush3.bf16.msra.mxu1 %v779_v54  ;;  %v399_v9 = vld [vmem:[#allocation9 + $0xc8] sm:$0xff]  ;;  %v787_v11 = vpack.c.bf16 %v381_v7, %v380_v6  ;;  %v382_v13 = vld [vmem:[#allocation9 + $0x40] sm:$0xff]  ;;  %v400_v15 = vld [vmem:[#allocation9 + $0xd0] sm:$0xff] }
  0x6d   :  { %782 = vmatprep.subr.bf16.mxu1 %v781_v57  ;;  %v789_v12 = vpack.c.bf16 %v399_v9, %v398_v8  ;;  %v383_v14 = vld [vmem:[#allocation9 + $0x48] sm:$0xff]  ;;  %v401_v16 = vld [vmem:[#allocation9 + $0xd8] sm:$0xff]  ;;  %v384_v20 = vld [vmem:[#allocation9 + $0x50] sm:$0xff] }
  0x6e   :  { %v105_v17 = vld [vmem:[#allocation3] sm:$0xff]  ;;  %v791_v18 = vpack.c.bf16 %v383_v14, %v382_v13  ;;  %v793_v19 = vpack.c.bf16 %v401_v16, %v400_v15  ;;  %v403_v23 = vld [vmem:[#allocation9 + $0xe8] sm:$0xff]  ;;  %v108_v28 = vld [vmem:[#allocation3 + $0x18] sm:$0xff] }
  0x6f   :  { %760 = vmatpush1.bf16.msra.mxu0 %v759_v34  ;;  %v385_v21 = vld [vmem:[#allocation9 + $0x58] sm:$0xff]  ;;  %v402_v22 = vld [vmem:[#allocation9 + $0xe0] sm:$0xff]  ;;  %v107_v27 = vld [vmem:[#allocation3 + $0x10] sm:$0xff] }
  0x70   :  { %762 = vmatprep.subr.bf16.mxu0 %v761_v40  ;;  %784 = vmatpush3.bf16.msra.mxu1 %v783_v2  ;;  %v795_v25 = vpack.c.bf16 %v385_v21, %v384_v20  ;;  %v797_v26 = vpack.c.bf16 %v403_v23, %v402_v22  ;;  %v109_v29 = vld [vmem:[#allocation3 + $0x20] sm:$0xff]  ;;  %v110_v30 = vld [vmem:[#allocation3 + $0x28] sm:$0xff]  ;;  %v111_v31 = vld [vmem:[#allocation3 + $0x30] sm:$0xff] }
  0x71   :  { %786 = vmatprep.subr.bf16.mxu1 %v785_v5  ;;  %v112_v32 = vld [vmem:[#allocation3 + $0x38] sm:$0xff]  ;;  %v113_v33 = vld [vmem:[#allocation3 + $0x40] sm:$0xff]  ;;  %v114_v34 = vld [vmem:[#allocation3 + $0x48] sm:$0xff] }
  0x72   :  { %v115_v35 = vld [vmem:[#allocation3 + $0x50] sm:$0xff]  ;;  %v116_v36 = vld [vmem:[#allocation3 + $0x58] sm:$0xff]  ;;  %v117_v37 = vld [vmem:[#allocation3 + $0x60] sm:$0xff] }
  0x73   :  { %764 = vmatpush1.bf16.msra.mxu0 %v763_v51  ;;  %v118_v38 = vld [vmem:[#allocation3 + $0x68] sm:$0xff]  ;;  %v119_v39 = vld [vmem:[#allocation3 + $0x70] sm:$0xff]  ;;  %v120_v40 = vld [vmem:[#allocation3 + $0x78] sm:$0xff]  ;;  %v156_v51 = vshrl.u32 %v155_v50, 7 }
  0x74   :  { %766 = vmatprep.subr.bf16.mxu0 %v765_v55  ;;  %788 = vmatpush3.bf16.msra.mxu1 %v787_v11  ;;  %v386_v41 = vld [vmem:[#allocation9 + $0x60] sm:$0xff]  ;;  %v387_v42 = vld [vmem:[#allocation9 + $0x68] sm:$0xff]  ;;  %v404_v44 = vld [vmem:[#allocation9 + $0xf0] sm:$0xff] }
  0x75   :  { %790 = vmatprep.subr.bf16.mxu1 %v789_v12  ;;  %v799_v43 = vpack.c.bf16 %v387_v42, %v386_v41  ;;  %v405_v45 = vld [vmem:[#allocation9 + $0xf8] sm:$0xff]  ;;  %v388_v47 = vld [vmem:[#allocation9 + $0x70] sm:$0xff]  ;;  %v157_v52 = vsub.s32 0, %v156_v51  ;;  %v161_v54 = vsub.s32 1, %v156_v51 }
  0x76   :  { %v801_v46 = vpack.c.bf16 %v405_v45, %v404_v44  ;;  %v389_v48 = vld [vmem:[#allocation9 + $0x78] sm:$0xff] }
  0x77   :  { %768 = vmatpush1.bf16.msra.mxu0 %v767_v63  ;;  %v803_v49 = vpack.c.bf16 %v389_v48, %v388_v47  ;;  %v153_v53 = vld [vmem:[#allocation8] sm:$0x3] }
  0x78   :  { %770 = vmatprep.subr.bf16.mxu0 %v769_v3  ;;  %792 = vmatpush3.bf16.msra.mxu1 %v791_v18  ;;  %v1081_v55 = vrot.slane %v153_v53, %v161_v54 }
  0x79   :  { %794 = vmatprep.subr.bf16.mxu1 %v793_v19 }
  0x7b   :  { %772 = vmatpush1.bf16.msra.mxu0 %v771_v10 }
  0x7c   :  { %796 = vmatpush3.bf16.msra.mxu1 %v795_v25 }
  0x7d   :  { %798 = vmatprep.subr.bf16.mxu1 %v797_v26 }
  0x7e   :  { %230 = vmatmul.mubr.f32.vlgmr.msra.gmra.mrb[0].mxu0 %v105_v17 }
  0x7f   :  { %235 = vmatprep.mubr.f32.mxu0 %v965_v0 }
  0x80   :  { %800 = vmatpush3.bf16.msra.mxu1 %v799_v43 }
  0x81   :  { %802 = vmatprep.subr.bf16.mxu1 %v801_v46 }
  0x82   :  { %236 = vmatmul.mubr.f32.gmra.mrb[2].mxu0 %v106_v24 }
  0x83   :  { %241 = vmatprep.mubr.f32.mxu0 %v965_v0 }
  0x84   :  { %804 = vmatpush3.bf16.msra.mxu1 %v803_v49 }
  0x86   :  { %242 = vmatmul.mubr.f32.gmra.mrb[4].mxu0 %v107_v27 }
  0x87   :  { %247 = vmatprep.mubr.f32.mxu0 %v965_v0 }
  0x8a   :  { %248 = vmatmul.mubr.f32.gmra.mrb[6].mxu0 %v108_v28 }
  0x8b   :  { %253 = vmatprep.mubr.f32.mxu0 %v965_v0 }
  0x8e   :  { %254 = vmatmul.mubr.f32.gmra.mrb[8].mxu0 %v109_v29 }
  0x8f   :  { %259 = vmatprep.mubr.f32.mxu0 %v965_v0 }
  0x92   :  { %260 = vmatmul.mubr.f32.gmra.mrb[10].mxu0 %v110_v30 }
  0x93   :  { %265 = vmatprep.mubr.f32.mxu0 %v965_v0 }
  0x96   :  { %266 = vmatmul.mubr.f32.gmra.mrb[12].mxu0 %v111_v31 }
  0x97   :  { %271 = vmatprep.mubr.f32.mxu0 %v965_v0 }
  0x9a   :  { %272 = vmatmul.mubr.f32.gmra.mrb[14].mxu0 %v112_v32 }
  0x9b   :  { %277 = vmatprep.mubr.f32.mxu0 %v965_v0 }
  0x9e   :  { %278 = vmatmul.mubr.f32.gmra.mrb[16].mxu0 %v113_v33 }
  0x9f   :  { %283 = vmatprep.mubr.f32.mxu0 %v965_v0 }
  0xa2   :  { %284 = vmatmul.mubr.f32.gmra.mrb[18].mxu0 %v114_v34 }
  0xa3   :  { %289 = vmatprep.mubr.f32.mxu0 %v965_v0 }
  0xa6   :  { %290 = vmatmul.mubr.f32.gmra.mrb[20].mxu0 %v115_v35 }
  0xa7   :  { %295 = vmatprep.mubr.f32.mxu0 %v965_v0 }
  0xaa   :  { %296 = vmatmul.mubr.f32.gmra.mrb[22].mxu0 %v116_v36 }
  0xab   :  { %301 = vmatprep.mubr.f32.mxu0 %v965_v0 }
  0xae   :  { %302 = vmatmul.mubr.f32.gmra.mrb[24].mxu0 %v117_v37 }
  0xaf   :  { %307 = vmatprep.mubr.f32.mxu0 %v965_v0 }
  0xb2   :  { %308 = vmatmul.mubr.f32.gmra.mrb[26].mxu0 %v118_v38 }
  0xb3   :  { %313 = vmatprep.mubr.f32.mxu0 %v965_v0 }
  0xb6   :  { %314 = vmatmul.mubr.f32.gmra.mrb[28].mxu0 %v119_v39 }
  0xb7   :  { %319 = vmatprep.mubr.f32.mxu0 %v965_v0  ;;  %v1079_v0 = vrot.slane %v153_v53, %v157_v52 }
  0xba   :  { %320 = vmatmul.mubr.f32.gmra.mrb[30].mxu0 %v120_v40 }
 0x151   :  { %v231_v56 = vpop.f32.mrb[0].mxu0 }
 0x152   :  { %v232_v57 = vadd.f32 %v231_v56, %v1079_v0  ;;  %v233_v58 = vpop.f32.mrb[1].mxu0 }
 0x153   :  { %v234_v59 = vadd.f32 %v233_v58, %v1081_v55 }
 0x154   :  { %v326_v62 = vmax.f32 %v232_v57, 0.0 }
 0x155   :  { %v237_v60 = vpop.f32.mrb[2].mxu0  ;;  %v327_v61 = vmax.f32 %v234_v59, 0.0 }
 0x156   :  { %v238_v63 = vadd.f32 %v237_v60, %v1079_v0  ;;  %v239_v1 = vpop.f32.mrb[3].mxu0 }
 0x157   :  { %v240_v2 = vadd.f32 %v239_v1, %v1081_v55  ;;  %470 = vmatprep.mubr.f32.mxu1 %v327_v61 }
 0x158   :  { %471 = vmatmul.mubr.f32.vlgmr.msra.gmra.mrb[0].mxu1 %v326_v62  ;;  %v328_v5 = vmax.f32 %v238_v63, 0.0 }
 0x159   :  { %v329_v3 = vmax.f32 %v240_v2, 0.0  ;;  %v243_v4 = vpop.f32.mrb[4].mxu0 }
 0x15a   :  { %v244_v6 = vadd.f32 %v243_v4, %v1079_v0  ;;  %v245_v7 = vpop.f32.mrb[5].mxu0 }
 0x15b   :  { %v246_v8 = vadd.f32 %v245_v7, %v1081_v55  ;;  %475 = vmatprep.mubr.f32.mxu1 %v329_v3 }
 0x15c   :  { %476 = vmatmul.mubr.f32.gmra.mrb[2].mxu1 %v328_v5  ;;  %v330_v11 = vmax.f32 %v244_v6, 0.0 }
 0x15d   :  { %v331_v9 = vmax.f32 %v246_v8, 0.0  ;;  %v249_v10 = vpop.f32.mrb[6].mxu0 }
 0x15e   :  { %v250_v12 = vadd.f32 %v249_v10, %v1079_v0  ;;  %v251_v13 = vpop.f32.mrb[7].mxu0 }
 0x15f   :  { %v252_v14 = vadd.f32 %v251_v13, %v1081_v55  ;;  %480 = vmatprep.mubr.f32.mxu1 %v331_v9 }
 0x160   :  { %481 = vmatmul.mubr.f32.gmra.mrb[4].mxu1 %v330_v11  ;;  %v332_v17 = vmax.f32 %v250_v12, 0.0 }
 0x161   :  { %v333_v15 = vmax.f32 %v252_v14, 0.0  ;;  %v255_v16 = vpop.f32.mrb[8].mxu0 }
 0x162   :  { %v256_v18 = vadd.f32 %v255_v16, %v1079_v0  ;;  %v257_v19 = vpop.f32.mrb[9].mxu0 }
 0x163   :  { %v258_v20 = vadd.f32 %v257_v19, %v1081_v55  ;;  %485 = vmatprep.mubr.f32.mxu1 %v333_v15 }
 0x164   :  { %486 = vmatmul.mubr.f32.gmra.mrb[6].mxu1 %v332_v17  ;;  %v334_v23 = vmax.f32 %v256_v18, 0.0 }
 0x165   :  { %v335_v21 = vmax.f32 %v258_v20, 0.0  ;;  %v261_v22 = vpop.f32.mrb[10].mxu0 }
 0x166   :  { %v262_v24 = vadd.f32 %v261_v22, %v1079_v0  ;;  %v263_v25 = vpop.f32.mrb[11].mxu0 }
 0x167   :  { %v264_v26 = vadd.f32 %v263_v25, %v1081_v55  ;;  %490 = vmatprep.mubr.f32.mxu1 %v335_v21 }
 0x168   :  { %491 = vmatmul.mubr.f32.gmra.mrb[8].mxu1 %v334_v23  ;;  %v336_v29 = vmax.f32 %v262_v24, 0.0 }
 0x169   :  { %v337_v27 = vmax.f32 %v264_v26, 0.0  ;;  %v267_v28 = vpop.f32.mrb[12].mxu0 }
 0x16a   :  { %v268_v30 = vadd.f32 %v267_v28, %v1079_v0  ;;  %v269_v31 = vpop.f32.mrb[13].mxu0 }
 0x16b   :  { %v270_v32 = vadd.f32 %v269_v31, %v1081_v55  ;;  %495 = vmatprep.mubr.f32.mxu1 %v337_v27 }
 0x16c   :  { %496 = vmatmul.mubr.f32.gmra.mrb[10].mxu1 %v336_v29  ;;  %v338_v35 = vmax.f32 %v268_v30, 0.0  ;;  %v1115_v29 = vld [vmem:[#allocation11] ss:$0 sm:$0xff] }
 0x16d   :  { %v339_v33 = vmax.f32 %v270_v32, 0.0  ;;  %v273_v34 = vpop.f32.mrb[14].mxu0 }
 0x16e   :  { %v274_v36 = vadd.f32 %v273_v34, %v1079_v0  ;;  %v275_v37 = vpop.f32.mrb[15].mxu0 }
 0x16f   :  { %v276_v38 = vadd.f32 %v275_v37, %v1081_v55  ;;  %500 = vmatprep.mubr.f32.mxu1 %v339_v33 }
 0x170   :  { %501 = vmatmul.mubr.f32.gmra.mrb[12].mxu1 %v338_v35  ;;  %v340_v41 = vmax.f32 %v274_v36, 0.0 }
 0x171   :  { %v341_v39 = vmax.f32 %v276_v38, 0.0  ;;  %v279_v40 = vpop.f32.mrb[16].mxu0 }
 0x172   :  { %v280_v42 = vadd.f32 %v279_v40, %v1079_v0  ;;  %v281_v43 = vpop.f32.mrb[17].mxu0 }
 0x173   :  { %v282_v44 = vadd.f32 %v281_v43, %v1081_v55  ;;  %505 = vmatprep.mubr.f32.mxu1 %v341_v39 }
 0x174   :  { %506 = vmatmul.mubr.f32.gmra.mrb[14].mxu1 %v340_v41  ;;  %v342_v47 = vmax.f32 %v280_v42, 0.0 }
 0x175   :  { %v343_v45 = vmax.f32 %v282_v44, 0.0  ;;  %v285_v46 = vpop.f32.mrb[18].mxu0 }
 0x176   :  { %v286_v48 = vadd.f32 %v285_v46, %v1079_v0  ;;  %v287_v49 = vpop.f32.mrb[19].mxu0 }
 0x177   :  { %v288_v50 = vadd.f32 %v287_v49, %v1081_v55  ;;  %510 = vmatprep.mubr.f32.mxu1 %v343_v45 }
 0x178   :  { %511 = vmatmul.mubr.f32.gmra.mrb[16].mxu1 %v342_v47  ;;  %v344_v53 = vmax.f32 %v286_v48, 0.0 }
 0x179   :  { %v345_v51 = vmax.f32 %v288_v50, 0.0  ;;  %v291_v52 = vpop.f32.mrb[20].mxu0 }
 0x17a   :  { %v292_v54 = vadd.f32 %v291_v52, %v1079_v0  ;;  %v293_v56 = vpop.f32.mrb[21].mxu0 }
 0x17b   :  { %v294_v57 = vadd.f32 %v293_v56, %v1081_v55  ;;  %515 = vmatprep.mubr.f32.mxu1 %v345_v51 }
 0x17c   :  { %516 = vmatmul.mubr.f32.gmra.mrb[18].mxu1 %v344_v53  ;;  %v346_v60 = vmax.f32 %v292_v54, 0.0 }
 0x17d   :  { %v347_v58 = vmax.f32 %v294_v57, 0.0  ;;  %v297_v59 = vpop.f32.mrb[22].mxu0 }
 0x17e   :  { %v298_v61 = vadd.f32 %v297_v59, %v1079_v0  ;;  %v299_v62 = vpop.f32.mrb[23].mxu0 }
 0x17f   :  { %v300_v63 = vadd.f32 %v299_v62, %v1081_v55  ;;  %520 = vmatprep.mubr.f32.mxu1 %v347_v58 }
 0x180   :  { %521 = vmatmul.mubr.f32.gmra.mrb[20].mxu1 %v346_v60  ;;  %v348_v3 = vmax.f32 %v298_v61, 0.0 }
 0x181   :  { %v349_v1 = vmax.f32 %v300_v63, 0.0  ;;  %v303_v2 = vpop.f32.mrb[24].mxu0 }
 0x182   :  { %v304_v4 = vadd.f32 %v303_v2, %v1079_v0  ;;  %v305_v5 = vpop.f32.mrb[25].mxu0 }
 0x183   :  { %v306_v6 = vadd.f32 %v305_v5, %v1081_v55  ;;  %525 = vmatprep.mubr.f32.mxu1 %v349_v1 }
 0x184   :  { %526 = vmatmul.mubr.f32.gmra.mrb[22].mxu1 %v348_v3  ;;  %v350_v9 = vmax.f32 %v304_v4, 0.0 }
 0x185   :  { %v351_v7 = vmax.f32 %v306_v6, 0.0  ;;  %v309_v8 = vpop.f32.mrb[26].mxu0 }
 0x186   :  { %v310_v10 = vadd.f32 %v309_v8, %v1079_v0  ;;  %v311_v11 = vpop.f32.mrb[27].mxu0 }
 0x187   :  { %v312_v12 = vadd.f32 %v311_v11, %v1081_v55  ;;  %530 = vmatprep.mubr.f32.mxu1 %v351_v7 }
 0x188   :  { %531 = vmatmul.mubr.f32.gmra.mrb[24].mxu1 %v350_v9  ;;  %v352_v15 = vmax.f32 %v310_v10, 0.0 }
 0x189   :  { %v353_v13 = vmax.f32 %v312_v12, 0.0  ;;  %v315_v14 = vpop.f32.mrb[28].mxu0 }
 0x18a   :  { %v316_v16 = vadd.f32 %v315_v14, %v1079_v0  ;;  %v317_v17 = vpop.f32.mrb[29].mxu0 }
 0x18b   :  { %v318_v18 = vadd.f32 %v317_v17, %v1081_v55  ;;  %535 = vmatprep.mubr.f32.mxu1 %v353_v13 }
 0x18c   :  { %536 = vmatmul.mubr.f32.gmra.mrb[26].mxu1 %v352_v15  ;;  %v354_v21 = vmax.f32 %v316_v16, 0.0 }
 0x18d   :  { %v355_v19 = vmax.f32 %v318_v18, 0.0  ;;  %v321_v20 = vpop.f32.mrb[30].mxu0 }
 0x18e   :  { %v322_v22 = vadd.f32 %v321_v20, %v1079_v0  ;;  %v323_v23 = vpop.f32.mrb[31].mxu0 }
 0x18f   :  { %v324_v24 = vadd.f32 %v323_v23, %v1081_v55  ;;  %540 = vmatprep.mubr.f32.mxu1 %v355_v19 }
 0x190   :  { %541 = vmatmul.mubr.f32.gmra.mrb[28].mxu1 %v354_v21  ;;  %v356_v26 = vmax.f32 %v322_v22, 0.0 }
 0x191   :  { %v357_v25 = vmax.f32 %v324_v24, 0.0 }
 0x193   :  { %545 = vmatprep.mubr.f32.mxu1 %v357_v25 }
 0x194   :  { %546 = vmatmul.mubr.f32.gmra.mrb[30].mxu1 %v356_v26 }
 0x22b   :  { %v693_v27 = vpop.f32.mrb[0].mxu1 }
 0x22c   :  { %v694_v28 = vpop.f32.mrb[1].mxu1 }
 0x22d   :  { %v695_v30 = vadd.f32 %v694_v28, %v693_v27 }
 0x22f   :  { %v609_v31 = vadd.f32 %v695_v30, %v1115_v29  ;;  %v696_v32 = vpop.f32.mrb[2].mxu1 }
 0x230   :  { %v697_v33 = vpop.f32.mrb[3].mxu1 }
 0x231   :  { %625 = vst [vmem:[#allocation12] sm:$0xff] %v609_v31  ;;  %v698_v0 = vadd.f32 %v697_v33, %v696_v32 }
 0x233   :  { %v610_v34 = vadd.f32 %v698_v0, %v1115_v29  ;;  %v699_v55 = vpop.f32.mrb[4].mxu1 }
 0x234   :  { %v700_v35 = vpop.f32.mrb[5].mxu1 }
 0x235   :  { %626 = vst [vmem:[#allocation12 + $0x8] sm:$0xff] %v610_v34  ;;  %v701_v36 = vadd.f32 %v700_v35, %v699_v55 }
 0x237   :  { %v611_v37 = vadd.f32 %v701_v36, %v1115_v29  ;;  %v702_v38 = vpop.f32.mrb[6].mxu1 }
 0x238   :  { %v703_v39 = vpop.f32.mrb[7].mxu1 }
 0x239   :  { %627 = vst [vmem:[#allocation12 + $0x10] sm:$0xff] %v611_v37  ;;  %v704_v40 = vadd.f32 %v703_v39, %v702_v38 }
 0x23b   :  { %v612_v41 = vadd.f32 %v704_v40, %v1115_v29  ;;  %v705_v42 = vpop.f32.mrb[8].mxu1 }
 0x23c   :  { %v706_v43 = vpop.f32.mrb[9].mxu1 }
 0x23d   :  { %628 = vst [vmem:[#allocation12 + $0x18] sm:$0xff] %v612_v41  ;;  %v707_v44 = vadd.f32 %v706_v43, %v705_v42 }
 0x23f   :  { %v613_v45 = vadd.f32 %v707_v44, %v1115_v29  ;;  %v708_v46 = vpop.f32.mrb[10].mxu1 }
 0x240   :  { %v709_v47 = vpop.f32.mrb[11].mxu1 }
 0x241   :  { %629 = vst [vmem:[#allocation12 + $0x20] sm:$0xff] %v613_v45  ;;  %v710_v48 = vadd.f32 %v709_v47, %v708_v46 }
 0x243   :  { %v614_v49 = vadd.f32 %v710_v48, %v1115_v29  ;;  %v711_v50 = vpop.f32.mrb[12].mxu1 }
 0x244   :  { %v712_v51 = vpop.f32.mrb[13].mxu1 }
 0x245   :  { %630 = vst [vmem:[#allocation12 + $0x28] sm:$0xff] %v614_v49  ;;  %v713_v52 = vadd.f32 %v712_v51, %v711_v50 }
 0x247   :  { %v615_v53 = vadd.f32 %v713_v52, %v1115_v29  ;;  %v714_v54 = vpop.f32.mrb[14].mxu1 }
 0x248   :  { %v715_v56 = vpop.f32.mrb[15].mxu1 }
 0x249   :  { %631 = vst [vmem:[#allocation12 + $0x30] sm:$0xff] %v615_v53  ;;  %v716_v57 = vadd.f32 %v715_v56, %v714_v54 }
 0x24b   :  { %v616_v58 = vadd.f32 %v716_v57, %v1115_v29  ;;  %v717_v59 = vpop.f32.mrb[16].mxu1 }
 0x24c   :  { %v718_v60 = vpop.f32.mrb[17].mxu1 }
 0x24d   :  { %632 = vst [vmem:[#allocation12 + $0x38] sm:$0xff] %v616_v58  ;;  %v719_v61 = vadd.f32 %v718_v60, %v717_v59 }
 0x24f   :  { %v617_v62 = vadd.f32 %v719_v61, %v1115_v29  ;;  %v720_v63 = vpop.f32.mrb[18].mxu1 }
 0x250   :  { %v721_v1 = vpop.f32.mrb[19].mxu1 }
 0x251   :  { %633 = vst [vmem:[#allocation12 + $0x40] sm:$0xff] %v617_v62  ;;  %v722_v2 = vadd.f32 %v721_v1, %v720_v63 }
 0x253   :  { %v618_v3 = vadd.f32 %v722_v2, %v1115_v29  ;;  %v723_v4 = vpop.f32.mrb[20].mxu1 }
 0x254   :  { %v724_v5 = vpop.f32.mrb[21].mxu1 }
 0x255   :  { %634 = vst [vmem:[#allocation12 + $0x48] sm:$0xff] %v618_v3  ;;  %v725_v6 = vadd.f32 %v724_v5, %v723_v4 }
 0x257   :  { %v619_v7 = vadd.f32 %v725_v6, %v1115_v29  ;;  %v726_v8 = vpop.f32.mrb[22].mxu1 }
 0x258   :  { %v727_v9 = vpop.f32.mrb[23].mxu1 }
 0x259   :  { %635 = vst [vmem:[#allocation12 + $0x50] sm:$0xff] %v619_v7  ;;  %v728_v10 = vadd.f32 %v727_v9, %v726_v8 }
 0x25b   :  { %v620_v11 = vadd.f32 %v728_v10, %v1115_v29  ;;  %v729_v12 = vpop.f32.mrb[24].mxu1 }
 0x25c   :  { %v730_v13 = vpop.f32.mrb[25].mxu1 }
 0x25d   :  { %636 = vst [vmem:[#allocation12 + $0x58] sm:$0xff] %v620_v11  ;;  %v731_v14 = vadd.f32 %v730_v13, %v729_v12 }
 0x25f   :  { %v621_v15 = vadd.f32 %v731_v14, %v1115_v29  ;;  %v732_v16 = vpop.f32.mrb[26].mxu1 }
 0x260   :  { %v733_v17 = vpop.f32.mrb[27].mxu1 }
 0x261   :  { %637 = vst [vmem:[#allocation12 + $0x60] sm:$0xff] %v621_v15  ;;  %v734_v18 = vadd.f32 %v733_v17, %v732_v16 }
 0x263   :  { %v622_v19 = vadd.f32 %v734_v18, %v1115_v29  ;;  %v735_v20 = vpop.f32.mrb[28].mxu1 }
 0x264   :  { %v736_v21 = vpop.f32.mrb[29].mxu1 }
 0x265   :  { %638 = vst [vmem:[#allocation12 + $0x68] sm:$0xff] %v622_v19  ;;  %v737_v22 = vadd.f32 %v736_v21, %v735_v20 }
 0x267   :  { %v623_v23 = vadd.f32 %v737_v22, %v1115_v29  ;;  %v738_v24 = vpop.f32.mrb[30].mxu1 }
 0x268   :  { %v739_v25 = vpop.f32.mrb[31].mxu1 }
 0x269   :  { %639 = vst [vmem:[#allocation12 + $0x70] sm:$0xff] %v623_v23  ;;  %v740_v26 = vadd.f32 %v739_v25, %v738_v24 }
 0x26b   :  { %v624_v27 = vadd.f32 %v740_v26, %v1115_v29 }
 0x26d   :  { %640 = vst [vmem:[#allocation12 + $0x78] sm:$0xff] %v624_v27 }
 0x26e   :  { %937 = shalt.err (!%p934_p2)
}
 0x26f   :  { %s938_s8 = scalar_lea.hbm %s1153_s5, 2048 }
 0x270   :  { %p939_p3 = scmp.ne.s32.totalorder %s1153_s5, %s938_s8  ;;  %p942_p4 = scmp.lt.u32.totalorder %s938_s8, %s1153_s5 }
 0x272   :  { %p944_p5 = pnand %p942_p4, %p939_p3 }
 0x274   :  { %947 = shalt.err (!%p944_p5)
}
 0x275   :  { %652 = dma.vmem_to_hbm [thread:$0]  %s647_s3, 2048, %s1153_s5, [#allocation5], %s961_s18, %s961_s18, %s962_s19  }
 0x276   :  { %954 = dma.done.wait [#allocation5], 2048  }
 0x277   :  { %955 = vsyncadd [#allocation5], 4294965248 }
 0x278   :  { %656 = vsyncpa [#allocation4], 1 }
 0x279   :  { %657 = vsyncpa [#allocation7], 1 }
 0x27a   :  { %658 = vsyncpa [#allocation10], 1 }
 0x27b   :  { %659 = vsyncpa [#allocation5], 1 }

</bundles_post_ra>
